<compile_context>
chip_gen: v6e
topology: v6e:2x2x1
jax: 0.10.0
libtpu: 0.0.40
codegen_flags: <defaults>
</compile_context>

<pallas_src>
import math
import jax
import jax.numpy as jnp
from jax import lax
from jax.experimental import pallas as pl
from jax.experimental.pallas import tpu as pltpu


def _fused_gate_kernel(x_ref, w_ref, b_ref, o_ref):
    # x_ref : (TB, IN)   w_ref : (N, IN)   b_ref : (1, N)   o_ref : (TB, N)
    # Contract x's IN axis against w's IN axis (i.e. x @ w.T) on the MXU with
    # f32 accumulation -- no wrapper-side transpose of the weight needed.
    y = lax.dot_general(
        x_ref[...], w_ref[...],
        dimension_numbers=(((1,), (1,)), ((), ())),
        preferred_element_type=jnp.float32)
    y = y + b_ref[...]                                   # (1, N) broadcast over batch tile
    o_ref[...] = jax.nn.sigmoid(y).astype(o_ref.dtype)   # gate nonlinearity, f32 epilogue


def _choose_batch_tile(B, target):
    """Pick a legal sublane-aligned batch tile (multiple of 8, or the full batch)."""
    if B <= target:
        return B                          # full-dim block is always legal
    return max(8, (target // 8) * 8)


def fused_sigmoid_gates(xh, W_stacked, b_stacked, *, block_batch=512):
    """sigmoid(xh @ W_stacked.T + b_stacked) with gate weights stacked along the
    hidden axis.  W_stacked: (N, IN) = concat of per-gate (H, IN) weights,
    b_stacked: (1, N).  Returns (B, N); slice per-gate columns outside."""
    B, IN = xh.shape
    N, IN_w = W_stacked.shape
    assert IN == IN_w, "xh feature dim must match W's second dim"
    assert b_stacked.shape == (1, N)

    TB = _choose_batch_tile(B, block_batch)
    grid = (pl.cdiv(B, TB),)

    return pl.pallas_call(
        _fused_gate_kernel,
        out_shape=jax.ShapeDtypeStruct((B, N), xh.dtype),
        grid=grid,
        in_specs=[
            pl.BlockSpec((TB, IN), lambda i: (i, 0)),   # batch-tiled activations
            pl.BlockSpec((N, IN), lambda i: (0, 0)),    # weights VMEM-resident across grid
            pl.BlockSpec((1, N), lambda i: (0, 0)),     # bias   VMEM-resident across grid
        ],
        out_specs=pl.BlockSpec((TB, N), lambda i: (i, 0)),
        compiler_params=pltpu.CompilerParams(
            dimension_semantics=("parallel",)),         # megacore / v7x dual-TC sharding
    )(xh, W_stacked, b_stacked)


def input_output_update_gate(xh, W, b):
    """Single-gate forward, exactly the PyTorch module: sigmoid(xh @ W.T + b).

    NOTE: with a lone gate the output last dim is H (=32 here), i.e. lane-sparse;
    prefer stacking the sibling gates and calling `fused_sigmoid_gates` once."""
    H = W.shape[0]
    return fused_sigmoid_gates(xh, W, b.reshape(1, H))


if __name__ == "__main__":
    # Shapes consistent with the module's __init__:
    #   hidden_dim=32, len(vocab)=20, opts.ident_vec_size=12 -> in_features=64
    hidden_dim = 32
    vocab_size = 20
    ident_vec_size = 12
    in_features = vocab_size + ident_vec_size + hidden_dim   # 64
    batch = 64
    num_gates = 4            # input / output / update / candidate siblings

    key = jax.random.PRNGKey(0)
    kx, *kparams = jax.random.split(key, 1 + 2 * num_gates)

    # Deterministic init mirroring nn.init.uniform_(-k, k), k = 1/sqrt(hidden_dim)
    k = 1.0 / math.sqrt(hidden_dim)
    Ws, bs = [], []
    for g in range(num_gates):
        Ws.append(jax.random.uniform(kparams[2 * g], (hidden_dim, in_features),
                                     minval=-k, maxval=k, dtype=jnp.float32))
        bs.append(jax.random.uniform(kparams[2 * g + 1], (hidden_dim,),
                                     minval=-k, maxval=k, dtype=jnp.float32))

    xh = jax.random.normal(kx, (batch, in_features), dtype=jnp.float32)

    # One-time (init-style) stacking along the hidden axis -> lane-dense N = 128.
    W_stacked = jnp.concatenate(Ws, axis=0)                               # (G*H, IN)
    b_stacked = jnp.concatenate(bs, axis=0).reshape(1, num_gates * hidden_dim)

    # Fused path: one kernel call for all sibling gates, batch tiled (grid of 2).
    fused = fused_sigmoid_gates(xh, W_stacked, b_stacked, block_batch=32)
    fused = jax.block_until_ready(fused)
    assert fused.shape == (batch, num_gates * hidden_dim)

    ok = True
    for g in range(num_gates):
        ref_g = jax.nn.sigmoid(xh @ Ws[g].T + bs[g])
        got_g = fused[:, g * hidden_dim:(g + 1) * hidden_dim]
        ok &= bool(jnp.allclose(got_g, ref_g, atol=1e-5, rtol=1e-5))
    assert ok

    # Single-gate path (the literal module forward) also goes through the kernel.
    single = jax.block_until_ready(input_output_update_gate(xh, Ws[0], bs[0]))
    ref0 = jax.nn.sigmoid(xh @ Ws[0].T + bs[0])
    assert single.shape == (batch, hidden_dim)
    assert jnp.allclose(single, ref0, atol=1e-5, rtol=1e-5)

    print("KERNEL_OK")
</pallas_src>

<mosaic_0001>
module attributes {stable_mosaic.version = 11 : i64} {
  func.func @_fused_gate_kernel(%arg0: i32, %arg1: memref<32x64xf32, #tpu.memory_space<vmem>>, %arg2: memref<128x64xf32, #tpu.memory_space<vmem>>, %arg3: memref<1x128xf32, #tpu.memory_space<vmem>>, %arg4: memref<32x128xf32, #tpu.memory_space<vmem>>) attributes {dimension_semantics = [#tpu.dimension_semantics<parallel>], iteration_bounds = array<i64: 2>, scalar_prefetch = 0 : i64, scratch_operands = 0 : i64, tpu.core_type = #tpu.core_type<tc>, window_params = [{transform_indices = @transform_0, window_bounds = array<i64: 32, 64>}, {pipeline_mode = #tpu.pipeline_mode<synchronous>, transform_indices = @transform_1, window_bounds = array<i64: 128, 64>}, {pipeline_mode = #tpu.pipeline_mode<synchronous>, transform_indices = @transform_2, window_bounds = array<i64: 1, 128>}, {transform_indices = @transform_3, window_bounds = array<i64: 32, 128>}]} {
    %c0 = arith.constant 0 : index
    %c0_0 = arith.constant 0 : index
    %0 = vector.load %arg1[%c0, %c0_0] : memref<32x64xf32, #tpu.memory_space<vmem>>, vector<32x64xf32>
    %c0_1 = arith.constant 0 : index
    %c0_2 = arith.constant 0 : index
    %1 = vector.load %arg2[%c0_1, %c0_2] : memref<128x64xf32, #tpu.memory_space<vmem>>, vector<128x64xf32>
    %cst = arith.constant dense<0.000000e+00> : vector<32x128xf32>
    %2 = tpu.matmul %0, %1, %cst {dimension_numbers = #tpu.dot_dimension_numbers<[1], [1], [0], [0], [0, 0, 1, 0], [], []>} : vector<32x64xf32>, vector<128x64xf32>, vector<32x128xf32> -> vector<32x128xf32>
    %c0_3 = arith.constant 0 : index
    %c0_4 = arith.constant 0 : index
    %3 = vector.load %arg3[%c0_3, %c0_4] : memref<1x128xf32, #tpu.memory_space<vmem>>, vector<1x128xf32>
    %4 = vector.broadcast %3 : vector<1x128xf32> to vector<32x128xf32>
    %5 = arith.addf %2, %4 : vector<32x128xf32>
    %6 = arith.negf %5 : vector<32x128xf32>
    %7 = math.exp %6 : vector<32x128xf32>
    %cst_5 = arith.constant 1.000000e+00 : f32
    %8 = vector.broadcast %cst_5 : f32 to vector<32x128xf32>
    %9 = arith.addf %8, %7 : vector<32x128xf32>
    %10 = arith.divf %8, %9 : vector<32x128xf32>
    %c0_6 = arith.constant 0 : index
    %c0_7 = arith.constant 0 : index
    %11 = vector.load %arg4[%c0_6, %c0_7] : memref<32x128xf32, #tpu.memory_space<vmem>>, vector<32x128xf32>
    tpu.vector_store %arg4[%c0_6, %c0_7], %10 {strides = array<i32>} : memref<32x128xf32, #tpu.memory_space<vmem>>, vector<32x128xf32>,
    return
  }
  func.func @transform_0(%arg0: i32) -> (i32, i32) {
    %c0_i32 = arith.constant 0 : i32
    %c0_i32_0 = arith.constant 0 : i32
    return %arg0, %c0_i32 : i32, i32
  }
  func.func @transform_1(%arg0: i32) -> (i32, i32) {
    %c0_i32 = arith.constant 0 : i32
    %c0_i32_0 = arith.constant 0 : i32
    %c0_i32_1 = arith.constant 0 : i32
    return %c0_i32, %c0_i32_0 : i32, i32
  }
  func.func @transform_2(%arg0: i32) -> (i32, i32) {
    %c0_i32 = arith.constant 0 : i32
    %c0_i32_0 = arith.constant 0 : i32
    %c0_i32_1 = arith.constant 0 : i32
    return %c0_i32, %c0_i32_0 : i32, i32
  }
  func.func @transform_3(%arg0: i32) -> (i32, i32) {
    %c0_i32 = arith.constant 0 : i32
    %c0_i32_0 = arith.constant 0 : i32
    return %arg0, %c0_i32 : i32, i32
  }
}

</mosaic_0001>

<bundles_post_ra>
// kernel: tpu_custom_call.1
= control target key start
LH: loop header
LB: loop body
LE: loop exit
PB: predicated region body
PF: predicated region fallthrough
CT: control target
= control target key end

     0   :  { %8 = vsyncpa [#allocation3], 0  ;;  %s945_s0 = inlined_call_operand.vmem [shape: f32[64,64], index: 0, kind: input, shape index: {}]   ;;  %s946_s1 = inlined_call_operand.vmem [shape: f32[128,64], index: 1, kind: input, shape index: {}]   ;;  %s947_s2 = inlined_call_operand.vmem [shape: f32[1,128], index: 2, kind: input, shape index: {}]   ;;  %s948_s3 = inlined_call_operand.hbm [shape: f32[64,128], index: 3, kind: output, shape index: {}]  }
   0x1   :  { %10 = vsyncpa [#allocation3 + $0x1], 0  ;;  %s719_s12 = smov 0   ;;  %s721_s13 = smov 0  }
   0x2   :  { %s723_s14 = smov 0   ;;  %s725_s15 = smov 0  }
   0x3 LB: > { %s740_s16 = sadd.s32 4294967295, %s694_s15   ;;  %s449_s17 = sadd.s32 4294967294, %s694_s15   ;;  %s694_s15 = sphi %s725_s15, %s954_s15   ;;  %s690_s14 = sphi %s723_s14, %s953_s14   ;;  %s686_s13 = sphi %s721_s13, %s952_s13   ;;  %s682_s12 = sphi %s719_s12, %s951_s12  }
   0x4   : > { %s744_s18 = sadd.s32 1, %s694_s15   ;;  %s91_s19 = sadd.s32 1, %s690_s14 }
   0x5   : > { %s88_s20 = ssub.s32 %s694_s15, %s744_s18  ;;  %p101_p0 = scmp.ne.s32.totalorder %s690_s14, %s686_s13 }
   0x6   : > { %p89_p1 = scmp.eq.s32.totalorder %s88_s20, 0  ;;  %p102_p2 = scmp.eq.s32.totalorder %s740_s16, 1 }
   0x7   : > { %p107_p3 = scmp.ne.s32.totalorder %s686_s13, %s682_s12  ;;  %p108_p4 = scmp.eq.s32.totalorder %s449_s17, 1 }
   0x8   : > { %s755_s21 = scalar_select %p89_p1, %s690_s14, %s91_s19  }
   0x9   : > { %p757_p5 = por %p102_p2, %p101_p0  ;;  %p761_p6 = por %p108_p4, %p107_p3 }
   0xa   : > { %p452_p7 = scmp.ge.s32.totalorder %s694_s15, 1  ;;  %p141_p8 = scmp.lt.s32.totalorder %s694_s15, 3 }
   0xc   : > { %p142_p9 = pnand %p452_p7, %p141_p8 }
   0xd   : > { %s454_s28 = sshll.u32 (!%p142_p9), %s740_s16, 2  ;;  %s486_s29 = sshll.u32 (!%p142_p9), %s740_s16, 9 }
   0xe   : > { %145 = sbr.rel (%p142_p9) target bundleno = 328 (0x148), region = 32  ;;  %p166_p10 = scmp.lt.s32.totalorder (!%p142_p9), %s454_s28, 7 }
   0xf   : > { %s901_s8 = scalar_lea.hbm (!%p142_p9), %s948_s3, %s486_s29  ;;  %s696_s10 = smov (!%p142_p9), [#allocation2]  }
  0x10   : > { %s638_s11 = sshll.u32 (!%p142_p9), %s696_s10, 4  ;;  %s639_s11 = int_to_ptr.vmem [resolvable:$false] %s638_s11 }
  0x11   : > { %s640_s17 = scalar_lea.vmem (!%p142_p9), %s639_s11, 1024 }
  0x13   : > { %v191_v0 = vld [vmem:[%s946_s1 + $0x78] sm:$0xff]  ;;  %vm199_vm0 = vcmask 523264   ;;  %v190_v1 = vld [vmem:[%s946_s1 + $0x70] sm:$0xff]  ;;  %s956_s28 = smov (!%p166_p10, %s454_s28), 7  ;;  %v189_v2 = vld [vmem:[%s946_s1 + $0x68] sm:$0xff] }
  0x14   : > { %507 = vmatprep.subr.msk.mxu0 %vm199_vm0, %v191_v0  ;;  %545 = vmatprep.subr.msk.mxu1 %vm199_vm0, %v191_v0  ;;  %s455_s4 = sshll.u32 %s956_s28, 3  ;;  %v188_v5 = vld [vmem:[%s946_s1 + $0x60] sm:$0xff]  ;;  %v187_v6 = vld [vmem:[%s946_s1 + $0x58] sm:$0xff]  ;;  %v186_v7 = vld [vmem:[%s946_s1 + $0x50] sm:$0xff] }
  0x15   : > { %508 = vmatpush3.xpose.msk.msra.mxu0 %vm199_vm0, %v191_v0  ;;  %561 = vmatpush3.xpose.msk.msra.mxu1 %vm199_vm0, %v191_v0  ;;  %s788_s7 = scalar_lea.vmem %s945_s0, %s455_s4  ;;  %v185_v8 = vld [vmem:[%s946_s1 + $0x48] sm:$0xff]  ;;  %v184_v9 = vld [vmem:[%s946_s1 + $0x40] sm:$0xff]  ;;  %v183_v10 = vld [vmem:[%s946_s1 + $0x38] sm:$0xff] }
  0x16   : > { %509 = vmatprep.subr.msk.mxu0 %vm199_vm0, %v190_v1  ;;  %546 = vmatprep.subr.msk.mxu1 %vm199_vm0, %v190_v1  ;;  %v172_v3 = vld [vmem:[%s788_s7] sm:$0xff]  ;;  %v174_v4 = vld [vmem:[%s788_s7 + $0x10] sm:$0xff]  ;;  %v181_v12 = vld [vmem:[%s946_s1 + $0x28] sm:$0xff] }
  0x17   : > { %539 = vmatprep.mubr.msk.f32.mxu0 %vm199_vm0, %v172_v3  ;;  %542 = vmatprep.mubr.msk.f32.mxu1 %vm199_vm0, %v174_v4  ;;  %v182_v11 = vld [vmem:[%s946_s1 + $0x30] sm:$0xff]  ;;  %v180_v13 = vld [vmem:[%s946_s1 + $0x20] sm:$0xff]  ;;  %v179_v14 = vld [vmem:[%s946_s1 + $0x18] sm:$0xff] }
  0x18   : > { %v178_v15 = vld [vmem:[%s946_s1 + $0x10] sm:$0xff]  ;;  %v177_v16 = vld [vmem:[%s946_s1 + $0x8] sm:$0xff]  ;;  %v176_v17 = vld [vmem:[%s946_s1] sm:$0xff] }
  0x19   : > { %510 = vmatpush3.xpose.msk.msra.mxu0 %vm199_vm0, %v190_v1  ;;  %562 = vmatpush3.xpose.msk.msra.mxu1 %vm199_vm0, %v190_v1  ;;  %v173_v18 = vld [vmem:[%s788_s7 + $0x8] sm:$0xff]  ;;  %v175_v19 = vld [vmem:[%s788_s7 + $0x18] sm:$0xff]  ;;  %v456_v20 = vld [vmem:[%s947_s2] ss:$0 sm:$0xff]  ;;  %s162_s7 = sand.u32 1, %s686_s13  }
  0x1a   : > { %511 = vmatprep.subr.msk.mxu0 %vm199_vm0, %v189_v2  ;;  %547 = vmatprep.subr.msk.mxu1 %vm199_vm0, %v189_v2  ;;  %s453_s28 = sshll.u32 %s162_s7, 5  ;;  %s905_s16 = scalar_lea.sflag [#allocation3], %s162_s7 }
  0x1b   : > { %s164_s30 = scalar_lea.vmem [#allocation2], %s453_s28 }
  0x1c   : > { %s387_s4 = sshll.u32 %s164_s30, 4  ;;  %s903_s4 = int_to_ptr.vmem [resolvable:$true] %s387_s4 }
  0x1d   : > { %512 = vmatpush3.xpose.msk.msra.mxu0 %vm199_vm0, %v189_v2  ;;  %563 = vmatpush3.xpose.msk.msra.mxu1 %vm199_vm0, %v189_v2  ;;  %s634_s9 = scalar_lea.vmem %s903_s4, 512  ;;  %p641_p0 = scmp.lt.s32.totalorder %s903_s4, %s639_s11 }
  0x1e   : > { %513 = vmatprep.subr.msk.mxu0 %vm199_vm0, %v188_v5  ;;  %548 = vmatprep.subr.msk.mxu1 %vm199_vm0, %v188_v5  ;;  %p635_p11 = scmp.ne.s32.totalorder %s903_s4, %s634_s9  ;;  %p642_p1 = scmp.lt.s32.totalorder %s640_s17, %s634_s9 }
  0x20   : > { %p636_p12 = pnand %p635_p11, %p757_p5  ;;  %p643_p2 = por %p642_p1, %p641_p0 }
  0x21   : > { %514 = vmatpush3.xpose.msk.msra.mxu0 %vm199_vm0, %v188_v5  ;;  %564 = vmatpush3.xpose.msk.msra.mxu1 %vm199_vm0, %v188_v5 }
  0x22   : > { %515 = vmatprep.subr.msk.mxu0 %vm199_vm0, %v187_v6  ;;  %549 = vmatprep.subr.msk.mxu1 %vm199_vm0, %v187_v6  ;;  %p637_p13 = pneg %p636_p12 }
  0x24   : > { %p644_p3 = pnand %p643_p2, %p637_p13 }
  0x25   : > { %516 = vmatpush3.xpose.msk.msra.mxu0 %vm199_vm0, %v187_v6  ;;  %565 = vmatpush3.xpose.msk.msra.mxu1 %vm199_vm0, %v187_v6 }
  0x26   : > { %517 = vmatprep.subr.msk.mxu0 %vm199_vm0, %v186_v7  ;;  %550 = vmatprep.subr.msk.mxu1 %vm199_vm0, %v186_v7 }
  0x29   : > { %518 = vmatpush3.xpose.msk.msra.mxu0 %vm199_vm0, %v186_v7  ;;  %566 = vmatpush3.xpose.msk.msra.mxu1 %vm199_vm0, %v186_v7 }
  0x2a   : > { %519 = vmatprep.subr.msk.mxu0 %vm199_vm0, %v185_v8  ;;  %551 = vmatprep.subr.msk.mxu1 %vm199_vm0, %v185_v8 }
  0x2d   : > { %520 = vmatpush3.xpose.msk.msra.mxu0 %vm199_vm0, %v185_v8  ;;  %567 = vmatpush3.xpose.msk.msra.mxu1 %vm199_vm0, %v185_v8 }
  0x2e   : > { %521 = vmatprep.subr.msk.mxu0 %vm199_vm0, %v184_v9  ;;  %552 = vmatprep.subr.msk.mxu1 %vm199_vm0, %v184_v9 }
  0x31   : > { %522 = vmatpush3.xpose.msk.msra.mxu0 %vm199_vm0, %v184_v9  ;;  %568 = vmatpush3.xpose.msk.msra.mxu1 %vm199_vm0, %v184_v9 }
  0x32   : > { %523 = vmatprep.subr.msk.mxu0 %vm199_vm0, %v183_v10  ;;  %553 = vmatprep.subr.msk.mxu1 %vm199_vm0, %v183_v10 }
  0x35   : > { %524 = vmatpush3.xpose.msk.msra.mxu0 %vm199_vm0, %v183_v10  ;;  %569 = vmatpush3.xpose.msk.msra.mxu1 %vm199_vm0, %v183_v10 }
  0x36   : > { %525 = vmatprep.subr.msk.mxu0 %vm199_vm0, %v182_v11  ;;  %554 = vmatprep.subr.msk.mxu1 %vm199_vm0, %v182_v11 }
  0x39   : > { %526 = vmatpush3.xpose.msk.msra.mxu0 %vm199_vm0, %v182_v11  ;;  %570 = vmatpush3.xpose.msk.msra.mxu1 %vm199_vm0, %v182_v11 }
  0x3a   : > { %527 = vmatprep.subr.msk.mxu0 %vm199_vm0, %v181_v12  ;;  %555 = vmatprep.subr.msk.mxu1 %vm199_vm0, %v181_v12 }
  0x3d   : > { %528 = vmatpush3.xpose.msk.msra.mxu0 %vm199_vm0, %v181_v12  ;;  %571 = vmatpush3.xpose.msk.msra.mxu1 %vm199_vm0, %v181_v12 }
  0x3e   : > { %529 = vmatprep.subr.msk.mxu0 %vm199_vm0, %v180_v13  ;;  %556 = vmatprep.subr.msk.mxu1 %vm199_vm0, %v180_v13 }
  0x41   : > { %530 = vmatpush3.xpose.msk.msra.mxu0 %vm199_vm0, %v180_v13  ;;  %572 = vmatpush3.xpose.msk.msra.mxu1 %vm199_vm0, %v180_v13 }
  0x42   : > { %531 = vmatprep.subr.msk.mxu0 %vm199_vm0, %v179_v14  ;;  %557 = vmatprep.subr.msk.mxu1 %vm199_vm0, %v179_v14 }
  0x45   : > { %532 = vmatpush3.xpose.msk.msra.mxu0 %vm199_vm0, %v179_v14  ;;  %573 = vmatpush3.xpose.msk.msra.mxu1 %vm199_vm0, %v179_v14 }
  0x46   : > { %533 = vmatprep.subr.msk.mxu0 %vm199_vm0, %v178_v15  ;;  %558 = vmatprep.subr.msk.mxu1 %vm199_vm0, %v178_v15 }
  0x49   : > { %534 = vmatpush3.xpose.msk.msra.mxu0 %vm199_vm0, %v178_v15  ;;  %574 = vmatpush3.xpose.msk.msra.mxu1 %vm199_vm0, %v178_v15 }
  0x4a   : > { %535 = vmatprep.subr.msk.mxu0 %vm199_vm0, %v177_v16  ;;  %559 = vmatprep.subr.msk.mxu1 %vm199_vm0, %v177_v16 }
  0x4d   : > { %536 = vmatpush3.xpose.msk.msra.mxu0 %vm199_vm0, %v177_v16  ;;  %575 = vmatpush3.xpose.msk.msra.mxu1 %vm199_vm0, %v177_v16 }
  0x4e   : > { %537 = vmatprep.subr.msk.mxu0 %vm199_vm0, %v176_v17  ;;  %560 = vmatprep.subr.msk.mxu1 %vm199_vm0, %v176_v17 }
  0x51   : > { %538 = vmatpush3.xpose.msk.msra.mxu0 %vm199_vm0, %v176_v17  ;;  %576 = vmatpush3.xpose.msk.msra.mxu1 %vm199_vm0, %v176_v17 }
  0x54   : > { %540 = vmatmul.mubr.msk.f32.vlgmr.msra.gmra.mxu0 %vm199_vm0, %v173_v18  ;;  %543 = vmatmul.mubr.msk.f32.vlgmr.msra.gmra.mxu1 %vm199_vm0, %v175_v19 }
 0x114   : > { %v541_v21 = vpop.f32.mrf.mxu0  ;;  %v544_v22 = vpop.f32.mrf.mxu1 }
 0x115   : > { %v332_v23 = vadd.f32 %v541_v21, %v456_v20  ;;  %v342_v24 = vadd.f32 %v544_v22, %v456_v20 }
 0x116   : > { %v326_v25 = vpop.f32.mrf.mxu0  ;;  %v336_v26 = vpop.f32.mrf.mxu1 }
 0x117   : > { %v478_v27 = vmul.f32 -1.442695, %v332_v23  ;;  %v480_v28 = vmul.f32 -1.442695, %v342_v24  ;;  %v327_v29 = vadd.f32 %v456_v20, %v326_v25  ;;  %v337_v30 = vadd.f32 %v456_v20, %v336_v26 }
 0x119   : > { %618 = vpow2.f32 %v478_v27  ;;  %v477_v31 = vmul.f32 -1.442695, %v327_v29  ;;  %v479_v32 = vmul.f32 -1.442695, %v337_v30 }
 0x11a   : > { %620 = vpow2.f32 %v480_v28 }
 0x11b   : > { %622 = vpow2.f32 %v477_v31 }
 0x11c   : > { %624 = vpow2.f32 %v479_v32 }
 0x126   : > { %v619_v33 = vpop.eup %618 }
 0x127   : > { %v621_v34 = vpop.eup %620  ;;  %v358_v35 = vadd.f32 1.0, %v619_v33 }
 0x128   : > { %v623_v36 = vpop.eup %622  ;;  %v360_v37 = vadd.f32 1.0, %v621_v34 }
 0x129   : > { %v625_v38 = vpop.eup %624  ;;  %626 = vrcp.f32 %v358_v35  ;;  %v357_v39 = vadd.f32 1.0, %v623_v36 }
 0x12a   : > { %628 = vrcp.f32 %v360_v37  ;;  %v359_v40 = vadd.f32 1.0, %v625_v38 }
 0x12b   : > { %630 = vrcp.f32 %v357_v39 }
 0x12c   : > { %632 = vrcp.f32 %v359_v40 }
 0x136   : > { %v627_v41 = vpop.eup %626 }
 0x137   : > { %v629_v42 = vpop.eup %628  ;;  %370 = vst [vmem:[%s164_s30 + $0x8] sm:$0xff] %v627_v41 }
 0x138   : > { %v631_v43 = vpop.eup %630  ;;  %372 = vst [vmem:[%s164_s30 + $0x18] sm:$0xff] %v629_v42 }
 0x139   : > { %v633_v44 = vpop.eup %632  ;;  %369 = vst [vmem:[%s164_s30] sm:$0xff] %v631_v43 }
 0x13a   : > { %371 = vst [vmem:[%s164_s30 + $0x10] sm:$0xff] %v633_v44 }
 0x13b   : > { %647 = shalt.err (!%p644_p3)
}
 0x13c   : > { %s648_s19 = scalar_lea.hbm %s901_s8, 512  ;;  %s652_s25 = scalar_lea.hbm %s948_s3, 1024 }
 0x13d   : > { %p649_p4 = scmp.ne.s32.totalorder %s901_s8, %s648_s19  ;;  %p653_p9 = scmp.lt.s32.totalorder %s901_s8, %s948_s3 }
 0x13e   : > { %p654_p10 = scmp.lt.s32.totalorder %s652_s25, %s648_s19 }
 0x13f   : > { %p650_p7 = pnand %p649_p4, %p757_p5 }
 0x140   : > { %p655_p11 = por %p654_p10, %p653_p9 }
 0x141   : > { %p651_p8 = pneg %p650_p7 }
 0x143   : > { %p656_p12 = pnand %p655_p11, %p651_p8 }
 0x145   : > { %659 = shalt.err (!%p656_p12)
}
 0x146   : > { %s697_s7 = smov 128   ;;  %s698_s28 = smov 8  }
 0x147   : > { %577 = dma.vmem_to_hbm [thread:$0]  (%p757_p5), %s903_s4, 512, %s901_s8, %s905_s16, %s697_s7, %s697_s7, %s698_s28  }
 0x148 PF: > { %p583_p13 = scmp.ge.s32.totalorder %s694_s15, 2  ;;  %s402_s29 = sand.u32 1, %s682_s12  }
 0x149   : > { %s403_s30 = scalar_lea.sflag [#allocation3], %s402_s29 }
 0x14a   : > { %p580_p0 = pnand %p583_p13, %p761_p6 }
 0x14c   : > { %p581_p1 = pneg %p580_p0 }
 0x14e   : > { %677 = dma.done.wait (%p581_p1), %s403_s30, 512  }
 0x14f   : > { %679 = vsyncadd (%p581_p1), %s403_s30, 4294966784  ;;  %p13_p2 = scmp.ge.s32.totalorder %s744_s18, 4   ;;  %s951_s12 = smov %s686_s13 }
 0x150   : > { %s952_s13 = smov %s690_s14  ;;  %s953_s14 = smov %s755_s21 }
 0x151   : > { %s954_s15 = smov %s744_s18  ;;  %15 = sbr.rel (!%p13_p2) target bundleno = 3 (0x3), region = 67 }
 0x156   :  { %408 = vsyncpa [#allocation3], 1 }
 0x157   :  { %410 = vsyncpa [#allocation3 + $0x1], 1 }

</bundles_post_ra>
